<compile_context>
chip_gen: v6e
topology: v6e:2x2x1
jax: 0.10.0
libtpu: 0.0.40
codegen_flags: <defaults>
</compile_context>

<pallas_src>
import jax
import jax.numpy as jnp
from jax.experimental import pallas as pl
from jax.experimental.pallas import tpu as pltpu


def _round_up(a, b):
    return (a + b - 1) // b * b


# --------------------------------------------------------------------------- kernels
def _torgb_kernel(w_ref, x_ref, o_ref):
    # w_ref: (1, 3, C)     per-batch modulated 1x1 conv weight (resident across HW tiles)
    # x_ref: (1, C, T_HW)  input feature tile
    # o_ref: (1, 3, T_HW)  output RGB tile
    o_ref[0] = jnp.dot(
        w_ref[0], x_ref[0], preferred_element_type=jnp.float32
    ).astype(o_ref.dtype)


def _make_ctiled_kernel(t_c, rem):
    # C tiled along the last ("arbitrary") grid axis; f32 accumulator in VMEM scratch.
    def kernel(w_ref, x_ref, o_ref, acc_ref):
        k = pl.program_id(2)
        nk = pl.num_programs(2)

        @pl.when(k == 0)
        def _():
            acc_ref[...] = jnp.zeros_like(acc_ref)

        xv = x_ref[0]
        if rem:  # static: mask stale (uninitialized) sublanes of the partial last C tile
            valid = jnp.where(k == nk - 1, rem, t_c)
            cmask = jax.lax.broadcasted_iota(jnp.int32, (t_c, 1), 0) < valid
            xv = jnp.where(cmask, xv, jnp.zeros_like(xv))

        acc_ref[...] += jnp.dot(w_ref[0], xv, preferred_element_type=jnp.float32)

        @pl.when(k == nk - 1)
        def _():
            o_ref[0] = acc_ref[...].astype(o_ref.dtype)

    return kernel


# --------------------------------------------------------------------------- sizing
def _vmem_limit_bytes():
    """Generation-aware scoped-VMEM limit with headroom."""
    try:
        cap = int(pltpu.get_tpu_info().vmem_capacity_bytes)
    except Exception:
        cap = 64 << 20  # conservative (v7x-sized) fallback
    limit = min(cap * 3 // 4, 100 << 20)  # v7x: ~48 MiB; v5e/v6e: ~96-100 MiB
    return max(limit, 32 << 20)


def _select_tiles(C, HW, itemsize, budget):
    """Pick (mode, t_hw, t_c, rem) so that the *padded*, double-buffered blocks fit budget."""
    sub = max(8, 32 // itemsize)          # sublane packing: 8 f32, 16 bf16, 32 int8/fp8
    pad3 = _round_up(3, sub)
    hw_lanes = _round_up(HW, 128)

    # ---- full-C candidate (single matmul per tile) ----
    w_fixed = 2 * pad3 * _round_up(C, 128) * itemsize            # dbl-buffered weight block
    per_lane = 2 * (_round_up(C, sub) + pad3) * itemsize         # dbl-buffered x + out per lane
    t_hw = (max(budget - w_fixed, 0) // per_lane) // 128 * 128
    t_hw = int(min(max(t_hw, 128), hw_lanes))
    if t_hw >= min(512, hw_lanes):
        return "full", t_hw, None, 0

    # ---- C-tiled candidate: keep lane tile large, tile the reduction axis ----
    t_hw = int(min(1024, hw_lanes))
    out_bytes = 2 * pad3 * t_hw * itemsize
    acc_bytes = 8 * t_hw * 4                                      # f32 accumulator (padded)
    avail = max(budget - out_bytes - acc_bytes, 0)
    per_c = 2 * t_hw * itemsize + 2 * pad3 * itemsize             # x row + weight column
    t_c = (avail // per_c) // 128 * 128                           # lanes of the weight block
    t_c = int(min(max(t_c, 128), _round_up(C, 128)))
    rem = C % t_c
    return "ctile", t_hw, t_c, rem


# --------------------------------------------------------------------------- wrapper
def to_rgb(x, y, lin_w, lin_b, conv_w, *,
           xla_fallback_bytes=2 << 20, vmem_budget_bytes=None):
    """x: (N, C, H, W); y: (N, S); lin_w: (3, S); lin_b: (3,); conv_w: (3, C, 1, 1).
    Returns (N, 3, H, W) in x.dtype."""
    N, C, H, W = x.shape
    HW = H * W
    dtype = x.dtype
    itemsize = jnp.dtype(dtype).itemsize

    # Style Linear + weight modulation: tiny tensors, pathological MXU shape -> plain XLA.
    s = (y.astype(jnp.float32) @ lin_w.astype(jnp.float32).T
         + lin_b.astype(jnp.float32))                                   # (N, 3)
    w2d = conv_w.reshape(3, C).astype(jnp.float32)                      # (3, C)
    mod_w = (w2d[None] * (1.0 + s[:, :, None])).astype(dtype)           # (N, 3, C)

    # Tiny-problem fallback: pallas_call launch + per-step overhead would dominate.
    if (N * (C + 3) * HW) * itemsize < xla_fallback_bytes:
        out = jnp.einsum("noc,nchw->nohw",
                         mod_w.astype(jnp.float32), x.astype(jnp.float32),
                         precision=jax.lax.Precision.HIGHEST)
        return out.astype(dtype)

    x_flat = x.reshape(N, C, HW)                                        # free reshape

    vmem_limit = _vmem_limit_bytes()
    budget = (vmem_budget_bytes if vmem_budget_bytes is not None
              else vmem_limit - (6 << 20))

    mode, t_hw, t_c, rem = _select_tiles(C, HW, itemsize, budget)

    # Keep both v7x TensorCores busy when N == 1: guarantee >= 2 HW tiles if possible.
    if N == 1:
        t_half = _round_up((HW + 1) // 2, 128)
        if t_half < HW:
            t_hw = min(t_hw, t_half)
    n_hw = pl.cdiv(HW, t_hw)

    cost = pl.CostEstimate(
        flops=int(2 * 3 * C * HW * N),
        bytes_accessed=int((N * (C + 3) * HW + N * 3 * C) * itemsize),
        transcendentals=0,
    )

    if mode == "full":
        out_flat = pl.pallas_call(
            _torgb_kernel,
            out_shape=jax.ShapeDtypeStruct((N, 3, HW), dtype),
            grid_spec=pltpu.PrefetchScalarGridSpec(
                num_scalar_prefetch=0,
                grid=(N, n_hw),
                in_specs=[
                    # Weight: constant across the HW axis -> only re-DMA'd per batch element.
                    pl.BlockSpec((1, 3, C), lambda n, t: (n, 0, 0)),
                    # Feature tile: lane-dense (multiple of 128 lanes).
                    pl.BlockSpec((1, C, t_hw), lambda n, t: (n, 0, t)),
                ],
                out_specs=pl.BlockSpec((1, 3, t_hw), lambda n, t: (n, 0, t)),
            ),
            compiler_params=pltpu.CompilerParams(
                dimension_semantics=("parallel", "parallel"),
                vmem_limit_bytes=int(vmem_limit),
            ),
            cost_estimate=cost,
        )(mod_w, x_flat)
    else:
        n_c = pl.cdiv(C, t_c)
        c_pad = n_c * t_c
        # Zero-pad the (tiny) weight along C so padded columns contribute exactly 0.
        mod_w_p = jnp.pad(mod_w, ((0, 0), (0, 0), (0, c_pad - C)))
        out_flat = pl.pallas_call(
            _make_ctiled_kernel(t_c, rem),
            out_shape=jax.ShapeDtypeStruct((N, 3, HW), dtype),
            grid_spec=pltpu.PrefetchScalarGridSpec(
                num_scalar_prefetch=0,
                grid=(N, n_hw, n_c),
                in_specs=[
                    pl.BlockSpec((1, 3, t_c), lambda n, t, k: (n, 0, k)),
                    pl.BlockSpec((1, t_c, t_hw), lambda n, t, k: (n, k, t)),
                ],
                out_specs=pl.BlockSpec((1, 3, t_hw), lambda n, t, k: (n, 0, t)),
                scratch_shapes=[pltpu.VMEM((3, t_hw), jnp.float32)],
            ),
            compiler_params=pltpu.CompilerParams(
                dimension_semantics=("parallel", "parallel", "arbitrary"),
                vmem_limit_bytes=int(vmem_limit),
            ),
            cost_estimate=cost,
        )(mod_w_p, x_flat)

    return out_flat.reshape(N, 3, H, W)


def reference(x, y, lin_w, lin_b, conv_w):
    """Pure-JAX reference matching the PyTorch forward exactly (f32)."""
    s = y @ lin_w.T + lin_b                                     # (N, 3)
    mod = conv_w[:, :, 0, 0][None] * (1.0 + s[:, :, None])      # (N, 3, C)
    return jnp.einsum("noc,nchw->nohw", mod, x,
                      precision=jax.lax.Precision.HIGHEST)


if __name__ == "__main__":
    key = jax.random.PRNGKey(0)
    k1, k2, k3, k4, k5 = jax.random.split(key, 5)

    # ---- Test 1: module demo shape, forced through the Pallas full-C path ----
    N, C, H, W, S = 2, 4, 16, 16, 8
    x = jax.random.normal(k1, (N, C, H, W), jnp.float32)
    y = jax.random.normal(k2, (N, S), jnp.float32)
    lin_w = jax.random.normal(k3, (3, S), jnp.float32) / jnp.sqrt(S)
    lin_b = jax.random.normal(k4, (3,), jnp.float32) * 0.01
    conv_w = jax.random.normal(k5, (3, C, 1, 1), jnp.float32) * jnp.sqrt(2.0 / C)

    out = jax.block_until_ready(
        to_rgb(x, y, lin_w, lin_b, conv_w, xla_fallback_bytes=0))
    ref = reference(x, y, lin_w, lin_b, conv_w)
    assert out.shape == (N, 3, H, W)
    assert jnp.allclose(out, ref, atol=1e-4, rtol=1e-4), "mismatch (full-C path)"

    # ---- Test 2: default call (tiny problem -> XLA fallback path) ----
    out2 = jax.block_until_ready(to_rgb(x, y, lin_w, lin_b, conv_w))
    assert jnp.allclose(out2, ref, atol=1e-4, rtol=1e-4), "mismatch (fallback path)"

    # ---- Test 3: C-reduction path (forced with a tiny budget), N=1 HW split ----
    N2, C2, H2, W2 = 1, 300, 32, 32
    kk = jax.random.split(jax.random.PRNGKey(1), 3)
    x2 = jax.random.normal(kk[0], (N2, C2, H2, W2), jnp.float32)
    y2 = jax.random.normal(kk[1], (N2, S), jnp.float32)
    conv_w2 = jax.random.normal(kk[2], (3, C2, 1, 1), jnp.float32) * jnp.sqrt(2.0 / C2)
    out3 = jax.block_until_ready(
        to_rgb(x2, y2, lin_w, lin_b, conv_w2,
               xla_fallback_bytes=0, vmem_budget_bytes=512 << 10))
    ref3 = reference(x2, y2, lin_w, lin_b, conv_w2)
    assert out3.shape == (N2, 3, H2, W2)
    assert jnp.allclose(out3, ref3, atol=1e-3, rtol=1e-3), "mismatch (C-tiled path)"

    print("KERNEL_OK")
</pallas_src>

<mosaic_0001>
module attributes {stable_mosaic.version = 11 : i64} {
  func.func @_torgb_kernel(%arg0: i32, %arg1: i32, %arg2: memref<1x3x4xf32, #tpu.memory_space<vmem>>, %arg3: memref<1x4x256xf32, #tpu.memory_space<vmem>>, %arg4: memref<1x3x256xf32, #tpu.memory_space<vmem>>) attributes {dimension_semantics = [#tpu.dimension_semantics<parallel>, #tpu.dimension_semantics<parallel>], iteration_bounds = array<i64: 2, 1>, scalar_prefetch = 0 : i64, scratch_operands = 0 : i64, tpu.core_type = #tpu.core_type<tc>, window_params = [{transform_indices = @transform_0, window_bounds = array<i64: 1, 3, 4>}, {transform_indices = @transform_1, window_bounds = array<i64: 1, 4, 256>}, {transform_indices = @transform_2, window_bounds = array<i64: 1, 3, 256>}]} {
    %c0 = arith.constant 0 : index
    %c0_0 = arith.constant 0 : index
    %c0_1 = arith.constant 0 : index
    %0 = vector.load %arg2[%c0, %c0_0, %c0_1] : memref<1x3x4xf32, #tpu.memory_space<vmem>>, vector<1x3x4xf32>
    %1 = vector.shape_cast %0 : vector<1x3x4xf32> to vector<3x4xf32>
    %c0_2 = arith.constant 0 : index
    %c0_3 = arith.constant 0 : index
    %c0_4 = arith.constant 0 : index
    %2 = vector.load %arg3[%c0_2, %c0_3, %c0_4] : memref<1x4x256xf32, #tpu.memory_space<vmem>>, vector<1x4x256xf32>
    %3 = vector.shape_cast %2 : vector<1x4x256xf32> to vector<4x256xf32>
    %cst = arith.constant dense<0.000000e+00> : vector<3x256xf32>
    %4 = tpu.matmul %1, %3, %cst {dimension_numbers = #tpu.dot_dimension_numbers<[1], [0], [0], [1], [0, 0, 1, 1], [], []>} : vector<3x4xf32>, vector<4x256xf32>, vector<3x256xf32> -> vector<3x256xf32>
    %c0_5 = arith.constant 0 : index
    %c0_6 = arith.constant 0 : index
    %c0_7 = arith.constant 0 : index
    %5 = vector.load %arg4[%c0_5, %c0_6, %c0_7] : memref<1x3x256xf32, #tpu.memory_space<vmem>>, vector<1x3x256xf32>
    %6 = vector.shape_cast %5 : vector<1x3x256xf32> to vector<3x256xf32>
    %7 = vector.shape_cast %4 : vector<3x256xf32> to vector<1x3x256xf32>
    tpu.vector_store %arg4[%c0_5, %c0_6, %c0_7], %7 {strides = array<i32>} : memref<1x3x256xf32, #tpu.memory_space<vmem>>, vector<1x3x256xf32>,
    return
  }
  func.func @transform_0(%arg0: i32, %arg1: i32) -> (i32, i32, i32) {
    %c0_i32 = arith.constant 0 : i32
    %c0_i32_0 = arith.constant 0 : i32
    %c0_i32_1 = arith.constant 0 : i32
    return %arg0, %c0_i32, %c0_i32_0 : i32, i32, i32
  }
  func.func @transform_1(%arg0: i32, %arg1: i32) -> (i32, i32, i32) {
    %c0_i32 = arith.constant 0 : i32
    %c0_i32_0 = arith.constant 0 : i32
    return %arg0, %c0_i32, %arg1 : i32, i32, i32
  }
  func.func @transform_2(%arg0: i32, %arg1: i32) -> (i32, i32, i32) {
    %c0_i32 = arith.constant 0 : i32
    %c0_i32_0 = arith.constant 0 : i32
    return %arg0, %c0_i32, %arg1 : i32, i32, i32
  }
}

</mosaic_0001>

<bundles_post_ra>
// kernel: tpu_custom_call.1
= control target key start
LH: loop header
LB: loop body
LE: loop exit
PB: predicated region body
PF: predicated region fallthrough
CT: control target
= control target key end

     0   :  { %7 = vsyncpa [#allocation3], 0  ;;  %s679_s0 = inlined_call_operand.vmem [shape: f32[2,3,4], index: 0, kind: input, shape index: {}]   ;;  %s680_s1 = inlined_call_operand.hbm [shape: f32[2,4,256], index: 1, kind: input, shape index: {}]   ;;  %s681_s2 = inlined_call_operand.vmem [shape: f32[2,3,256], index: 2, kind: output, shape index: {}]  }
   0x1   :  { %9 = vsyncpa [#allocation3 + $0x1], 0  ;;  %s576_s9 = smov 0   ;;  %s578_s10 = smov 0  }
   0x2   :  { %s580_s11 = smov 0   ;;  %s582_s12 = smov 0  }
   0x3   :  { %s584_s13 = smov 0   ;;  %s586_s14 = smov 0  }
   0x4 LB: > { %s403_s15 = sadd.s32 4294967295, %s557_s14   ;;  %s27_s16 = sadd.s32 1, %s553_s13  ;;  %s557_s14 = sphi %s586_s14, %s15_s14   ;;  %s553_s13 = sphi %s584_s13, %s689_s13   ;;  %s549_s12 = sphi %s582_s12, %s688_s12   ;;  %s545_s11 = sphi %s580_s11, %s687_s11   ;;  %s541_s10 = sphi %s578_s10, %s686_s10   ;;  %s537_s9 = sphi %s576_s9, %s685_s9  }
   0x5   : > { %p29_p0 = scmp.ge.s32.totalorder %s27_s16, 2  ;;  %s62_s17 = sadd.s32 1, %s545_s11 }
   0x6   : > { %p69_p1 = scmp.ne.s32.totalorder %s545_s11, %s541_s10  ;;  %p70_p2 = scmp.eq.s32.totalorder %s557_s14, 0 }
   0x7   : > { %s691_s16 = smov (%p29_p0, %s27_s16), 0  ;;  %p75_p4 = scmp.ne.s32.totalorder %s541_s10, %s537_s9 }
   0x8   : > { %p612_p3 = por %p70_p2, %p69_p1  ;;  %s57_s19 = ssub.s32 %s553_s13, %s691_s16 }
   0x9   : > { %p76_p5 = scmp.eq.s32.totalorder %s403_s15, 0  ;;  %p60_p6 = scmp.eq.s32.totalorder %s57_s19, 0 }
   0xa   : > { %p428_p8 = scmp.lt.s32.totalorder %s557_s14, 2  ;;  %s134_s22 = sand.u32 1, %s545_s11  }
   0xb   : > { %p619_p7 = por %p76_p5, %p75_p4  ;;  %s420_s23 = sshll.u32 %s553_s13, 7 }
   0xc   : > { %s625_s21 = scalar_select %p60_p6, %s545_s11, %s62_s17  }
   0xd   : > { %s407_s24 = sshll.u32 %s134_s22, 3  ;;  %s146_s27 = scalar_lea.hbm %s680_s1, %s420_s23 }
   0xe   : > { %s138_s28 = scalar_lea.vmem [#allocation2], %s407_s24  ;;  %p634_p9 = pnand %p428_p8, %p612_p3 }
   0xf   : > { %s148_s29 = sshll.u32 %s138_s28, 4  ;;  %p410_p10 = scmp.ge.s32.totalorder %s557_s14, 1  ;;  %s149_s29 = int_to_ptr.vmem [resolvable:$true] %s148_s29 }
  0x10   : > { %p153_p11 = scmp.lt.s32.totalorder %s557_s14, 3  ;;  %s135_s3 = scalar_lea.sflag [#allocation3], %s134_s22 }
  0x11   : > { %p481_p12 = pneg %p634_p9  ;;  %s492_s4 = scalar_lea.vmem %s149_s29, 128 }
  0x12   : > { %p493_p13 = scmp.ne.s32.totalorder %s149_s29, %s492_s4  ;;  %s559_s5 = smov [#allocation2]  }
  0x13   : > { %s497_s6 = sshll.u32 %s559_s5, 4  ;;  %s498_s6 = int_to_ptr.vmem [resolvable:$false] %s497_s6 }
  0x14   : > { %p495_p0 = pnand %p493_p13, %p481_p12  ;;  %s499_s7 = scalar_lea.vmem %s498_s6, 256 }
  0x15   : > { %p500_p2 = scmp.lt.s32.totalorder %s149_s29, %s498_s6  ;;  %p501_p3 = scmp.lt.s32.totalorder %s499_s7, %s492_s4 }
  0x16   : > { %p496_p1 = pneg %p495_p0 }
  0x17   : > { %p502_p4 = por %p501_p3, %p500_p2 }
  0x19   : > { %p503_p5 = pnand %p502_p4, %p496_p1 }
  0x1b   : > { %506 = shalt.err (!%p503_p5)
}
  0x1c   : > { %427 = dma.hbm_to_vmem [thread:$0]  (!%p634_p9), %s146_s27, 128, %s149_s29, %s135_s3  }
  0x1d   : > { %p154_p6 = pnand %p410_p10, %p153_p11 }
  0x1e   : > { %s159_s8 = sand.u32 (!%p154_p6), 1, %s541_s10  }
  0x1f   : > { %157 = sbr.rel (%p154_p6) target bundleno = 241 (0xf1), region = 28  ;;  %s411_s9 = sshll.u32 (!%p154_p6), %s159_s8, 3 }
  0x20   : > { %s160_s15 = scalar_lea.sflag (!%p154_p6), [#allocation3], %s159_s8  ;;  %s163_s17 = scalar_lea.vmem (!%p154_p6), [#allocation2], %s411_s9 }
  0x24   : > { %532 = dma.done.wait (%p619_p7), %s160_s15, 128  }
  0x25   : > { %534 = vsyncadd (%p619_p7), %s160_s15, 4294967168  ;;  %p192_p8 = scmp.lt.s32.totalorder %s549_s12, 1  ;;  %v560_v0 = vmov 0.0   ;;  %v208_v1 = vld [vmem:[%s163_s17] sm:$0xff]  ;;  %vm215_vm0 = vcmask 1043456   ;;  %vm211_vm1 = vcmask 31744  }
  0x26   : > { %284 = vmatprep.mubr.f32.mxu0 %v560_v0  ;;  %v210_v2 = vcombine.high %v208_v1, %v208_v1 }
  0x27   : > { %s693_s12 = smov (!%p192_p8, %s549_s12), 1 }
  0x28   : > { %s412_s18 = sshll.u32 %s693_s12, 2  ;;  %415 = vmatprep.subr.msk.mxu0 %vm215_vm0, %v210_v2  ;;  %s421_s20 = sshll.u32 %s693_s12, 3 }
  0x29   : > { %s195_s23 = scalar_lea.vmem %s679_s0, %s412_s18  ;;  %416 = vmatpush1.msk.msra.mxu0 %vm215_vm0, %v208_v1  ;;  %s205_s26 = scalar_lea.vmem %s681_s2, %s421_s20 }
  0x2a   : > { %v207_v3 = vld [vmem:[%s195_s23] sm:$0x7] }
  0x2b   : > { %417 = vmatmul.mubr.msk.f32.vlgmr.msra.gmra.mxu0 %vm211_vm1, %v207_v3 }
  0xeb   : > { %v286_v4 = vpop.f32.mrf.mxu0 }
  0xed   : > { %v288_v5 = vpop.f32.mrf.mxu0 }
  0xee   : > { %v293_v6 = vcombine.low %v286_v4, %v288_v5 }
  0xf0   : > { %295 = vst [vmem:[%s205_s26] sm:$0x77] %v293_v6 }
  0xf1 PF: > { %s15_s14 = sadd.s32 1, %s557_s14   ;;  %s685_s9 = smov %s541_s10 }
  0xf2   : > { %p12_p7 = scmp.ge.s32.totalorder %s15_s14, 4   ;;  %s686_s10 = smov %s545_s11 }
  0xf3   : > { %s687_s11 = smov %s625_s21  ;;  %s688_s12 = smov %s553_s13 }
  0xf4   : > { %s689_s13 = smov %s691_s16  ;;  %14 = sbr.rel (!%p12_p7) target bundleno = 4 (0x4), region = 71 }
  0xf9   :  { %326 = vsyncpa [#allocation3], 1 }
  0xfa   :  { %328 = vsyncpa [#allocation3 + $0x1], 1 }

</bundles_post_ra>
